<compile_context>
chip_gen: v7x
topology: tpu7x:2x2x1
jax: 0.10.0
libtpu: 0.0.40
codegen_flags: <defaults>
</compile_context>

<pallas_src>
import functools

import numpy as np
import jax
import jax.numpy as jnp
from jax.experimental import pallas as pl
from jax.experimental.pallas import tpu as pltpu


def _round_up(n, m):
    return ((n + m - 1) // m) * m


def mlp_kernel(x_ref, w1_ref, b1_ref, w2_ref, b2_ref, o_ref):
    # fc1: [TB, D_in] @ [D_in, H] on the MXU (bf16 operands, f32 accumulation).
    h = jnp.dot(x_ref[...], w1_ref[...], preferred_element_type=jnp.float32)
    # Bias + ReLU in f32 on the VPU.
    h = jnp.maximum(h + b1_ref[...], 0.0)
    # fc2: [TB, H] @ [H, D_out] on the MXU.
    y = jnp.dot(h.astype(jnp.bfloat16), w2_ref[...],
                preferred_element_type=jnp.float32)
    o_ref[...] = (y + b2_ref[...]).astype(o_ref.dtype)


def prepare_params(w1, b1, w2, b2):
    """One-time weight prep: pad feature dims to 128 lanes, cast to bf16.

    Weights are stored [in_features, out_features] (transpose of PyTorch's
    nn.Linear weight); biases are [1, features]. Returns padded params plus
    the original output dim (needed to slice the kernel output).
    """
    d_in, hidden = w1.shape
    d_out = w2.shape[1]
    d_in_p, hidden_p, d_out_p = (_round_up(d, 128) for d in (d_in, hidden, d_out))
    w1p = jnp.pad(w1.astype(jnp.bfloat16),
                  ((0, d_in_p - d_in), (0, hidden_p - hidden)))
    b1p = jnp.pad(b1.astype(jnp.float32), ((0, 0), (0, hidden_p - hidden)))
    w2p = jnp.pad(w2.astype(jnp.bfloat16),
                  ((0, hidden_p - hidden), (0, d_out_p - d_out)))
    b2p = jnp.pad(b2.astype(jnp.float32), ((0, 0), (0, d_out_p - d_out)))
    return (w1p, b1p, w2p, b2p), d_out


def _vmem_budget(weight_bytes, stream_bytes):
    """Scoped-VMEM request sized from the working set, capped per generation."""
    try:
        phys = pltpu.get_tpu_info().vmem_capacity_bytes
    except Exception:
        phys = 64 * 1024 * 1024  # conservative: v7x per-TensorCore VMEM
    cap = (phys * 3) // 4        # leave headroom for internal/pipeline scratch
    need = int(weight_bytes + stream_bytes) + (8 << 20)
    return int(min(max(need, 32 << 20), cap))


@functools.partial(jax.jit, static_argnames=("d_out", "block_b", "out_dtype"))
def mlp_forward(x, w1p, b1p, w2p, b2p, *, d_out, block_b=512, out_dtype=None):
    """x: [B, D_in] (any float dtype); padded/bf16 params from prepare_params."""
    B, d_in = x.shape
    d_in_p, hidden_p = w1p.shape
    d_out_p = w2p.shape[1]
    out_dt = np.dtype(x.dtype if out_dtype is None else out_dtype)

    # Batch tile: multiple of 8, up to block_b; prefer >=2 grid steps so the
    # "parallel" batch axis can split across v7x's two TensorCores.
    b_p8 = _round_up(B, 8)
    tb = min(block_b, b_p8)
    if b_p8 // tb < 2 and b_p8 >= 16:
        tb = _round_up((b_p8 + 1) // 2, 8)
    b_p = _round_up(b_p8, tb)

    # x preprocessing: bf16 cast (halves HBM read bytes); pad only if needed.
    xh = x.astype(jnp.bfloat16)
    if b_p != B or d_in_p != d_in:
        xh = jnp.pad(xh, ((0, b_p - B), (0, d_in_p - d_in)))

    # Working set: single-buffered resident weights/biases + double-buffered
    # x/out tiles + the f32 hidden intermediate.
    weight_bytes = (w1p.size + w2p.size) * 2 + (b1p.size + b2p.size) * 4
    stream_bytes = (2 * tb * d_in_p * 2
                    + 2 * tb * d_out_p * out_dt.itemsize
                    + tb * hidden_p * 4)
    vmem_limit = _vmem_budget(weight_bytes, stream_bytes)

    vmem = pltpu.MemorySpace.VMEM
    resident = dict(memory_space=vmem, pipeline_mode=pl.Buffered(1))

    out_p = pl.pallas_call(
        mlp_kernel,
        out_shape=jax.ShapeDtypeStruct((b_p, d_out_p), out_dt),
        grid=(b_p // tb,),
        in_specs=[
            # x tile walks the batch grid (double-buffered by Pallas).
            pl.BlockSpec((tb, d_in_p), lambda i: (i, 0), memory_space=vmem),
            # Weights / biases: constant index_map + single buffer -> one DMA,
            # resident in VMEM across all batch tiles.
            pl.BlockSpec((d_in_p, hidden_p), lambda i: (0, 0), **resident),
            pl.BlockSpec((1, hidden_p), lambda i: (0, 0), **resident),
            pl.BlockSpec((hidden_p, d_out_p), lambda i: (0, 0), **resident),
            pl.BlockSpec((1, d_out_p), lambda i: (0, 0), **resident),
        ],
        out_specs=pl.BlockSpec((tb, d_out_p), lambda i: (i, 0), memory_space=vmem),
        compiler_params=pltpu.CompilerParams(
            dimension_semantics=("parallel",),   # megacore sharding on v7x
            vmem_limit_bytes=vmem_limit,
        ),
    )(xh, w1p, b1p, w2p, b2p)

    if b_p != B or d_out_p != d_out:
        out_p = out_p[:B, :d_out]
    return out_p


def init_params(key, input_dim, hidden_dim, output_dim, dtype=jnp.float32):
    """Deterministic init mimicking nn.Linear's uniform(-1/sqrt(fan_in), ...)."""
    k1, k2, k3, k4 = jax.random.split(key, 4)
    bound1 = 1.0 / (input_dim ** 0.5)
    bound2 = 1.0 / (hidden_dim ** 0.5)
    # Stored transposed relative to PyTorch ([in, out] instead of [out, in]).
    w1 = jax.random.uniform(k1, (input_dim, hidden_dim), dtype, -bound1, bound1)
    b1 = jax.random.uniform(k2, (1, hidden_dim), dtype, -bound1, bound1)
    w2 = jax.random.uniform(k3, (hidden_dim, output_dim), dtype, -bound2, bound2)
    b2 = jax.random.uniform(k4, (1, output_dim), dtype, -bound2, bound2)
    return w1, b1, w2, b2


if __name__ == "__main__":
    input_dim, hidden_dim, output_dim = 32, 64, 16
    batch = 8

    key = jax.random.PRNGKey(0)
    kx, kp = jax.random.split(key)
    x = jax.random.normal(kx, (batch, input_dim), jnp.float32)
    w1, b1, w2, b2 = init_params(kp, input_dim, hidden_dim, output_dim)

    # One-time weight prep (pad + bf16 cast), reused across forward calls.
    (w1p, b1p, w2p, b2p), d_out = prepare_params(w1, b1, w2, b2)

    out = mlp_forward(x, w1p, b1p, w2p, b2p, d_out=d_out)
    out = jax.block_until_ready(out)
    assert out.shape == (batch, output_dim)

    # Reference with the same bf16-operand / f32-accumulate math as the kernel.
    h_ref = jnp.dot(x.astype(jnp.bfloat16), w1.astype(jnp.bfloat16),
                    preferred_element_type=jnp.float32) + b1
    h_ref = jnp.maximum(h_ref, 0.0)
    ref_bf16 = jnp.dot(h_ref.astype(jnp.bfloat16), w2.astype(jnp.bfloat16),
                       preferred_element_type=jnp.float32) + b2
    assert jnp.allclose(out, ref_bf16, atol=1e-2, rtol=1e-2)

    # Coarse check against the pure-f32 PyTorch-equivalent forward.
    ref_f32 = jnp.maximum(x @ w1 + b1, 0.0) @ w2 + b2
    assert jnp.allclose(out, ref_f32, atol=1e-1, rtol=1e-1)

    print("KERNEL_OK")
</pallas_src>

<mosaic_0001>
module attributes {stable_mosaic.version = 11 : i64} {
  func.func @mlp_kernel(%arg0: i32, %arg1: memref<8x128xbf16, #tpu.memory_space<vmem>>, %arg2: memref<128x128xbf16, #tpu.memory_space<vmem>>, %arg3: memref<1x128xf32, #tpu.memory_space<vmem>>, %arg4: memref<128x128xbf16, #tpu.memory_space<vmem>>, %arg5: memref<1x128xf32, #tpu.memory_space<vmem>>, %arg6: memref<8x128xf32, #tpu.memory_space<vmem>>) attributes {dimension_semantics = [#tpu.dimension_semantics<parallel>], iteration_bounds = array<i64: 1>, scalar_prefetch = 0 : i64, scratch_operands = 0 : i64, tpu.core_type = #tpu.core_type<tc>, window_params = [{transform_indices = @transform_0, window_bounds = array<i64: 8, 128>}, {pipeline_mode = #tpu.pipeline_mode<synchronous>, transform_indices = @transform_1, window_bounds = array<i64: 128, 128>}, {pipeline_mode = #tpu.pipeline_mode<synchronous>, transform_indices = @transform_2, window_bounds = array<i64: 1, 128>}, {pipeline_mode = #tpu.pipeline_mode<synchronous>, transform_indices = @transform_3, window_bounds = array<i64: 128, 128>}, {pipeline_mode = #tpu.pipeline_mode<synchronous>, transform_indices = @transform_4, window_bounds = array<i64: 1, 128>}, {transform_indices = @transform_5, window_bounds = array<i64: 8, 128>}]} {
    %c0 = arith.constant 0 : index
    %c0_0 = arith.constant 0 : index
    %0 = vector.load %arg1[%c0, %c0_0] : memref<8x128xbf16, #tpu.memory_space<vmem>>, vector<8x128xbf16>
    %c0_1 = arith.constant 0 : index
    %c0_2 = arith.constant 0 : index
    %1 = vector.load %arg2[%c0_1, %c0_2] : memref<128x128xbf16, #tpu.memory_space<vmem>>, vector<128x128xbf16>
    %cst = arith.constant dense<0.000000e+00> : vector<8x128xf32>
    %2 = tpu.matmul %0, %1, %cst {dimension_numbers = #tpu.dot_dimension_numbers<[1], [0], [0], [1], [0, 0, 1, 1], [], []>} : vector<8x128xbf16>, vector<128x128xbf16>, vector<8x128xf32> -> vector<8x128xf32>
    %c0_3 = arith.constant 0 : index
    %c0_4 = arith.constant 0 : index
    %3 = vector.load %arg3[%c0_3, %c0_4] : memref<1x128xf32, #tpu.memory_space<vmem>>, vector<1x128xf32>
    %4 = vector.broadcast %3 : vector<1x128xf32> to vector<8x128xf32>
    %5 = arith.addf %2, %4 : vector<8x128xf32>
    %cst_5 = arith.constant 0.000000e+00 : f32
    %6 = vector.broadcast %cst_5 : f32 to vector<8x128xf32>
    %7 = arith.maximumf %5, %6 : vector<8x128xf32>
    %8 = arith.truncf %7 : vector<8x128xf32> to vector<8x128xbf16>
    %c0_6 = arith.constant 0 : index
    %c0_7 = arith.constant 0 : index
    %9 = vector.load %arg4[%c0_6, %c0_7] : memref<128x128xbf16, #tpu.memory_space<vmem>>, vector<128x128xbf16>
    %cst_8 = arith.constant dense<0.000000e+00> : vector<8x128xf32>
    %10 = tpu.matmul %8, %9, %cst_8 {dimension_numbers = #tpu.dot_dimension_numbers<[1], [0], [0], [1], [0, 0, 1, 1], [], []>} : vector<8x128xbf16>, vector<128x128xbf16>, vector<8x128xf32> -> vector<8x128xf32>
    %c0_9 = arith.constant 0 : index
    %c0_10 = arith.constant 0 : index
    %11 = vector.load %arg5[%c0_9, %c0_10] : memref<1x128xf32, #tpu.memory_space<vmem>>, vector<1x128xf32>
    %12 = vector.broadcast %11 : vector<1x128xf32> to vector<8x128xf32>
    %13 = arith.addf %10, %12 : vector<8x128xf32>
    %c0_11 = arith.constant 0 : index
    %c0_12 = arith.constant 0 : index
    %14 = vector.load %arg6[%c0_11, %c0_12] : memref<8x128xf32, #tpu.memory_space<vmem>>, vector<8x128xf32>
    tpu.vector_store %arg6[%c0_11, %c0_12], %13 {strides = array<i32>} : memref<8x128xf32, #tpu.memory_space<vmem>>, vector<8x128xf32>,
    return
  }
  func.func @transform_0(%arg0: i32) -> (i32, i32) {
    %c0_i32 = arith.constant 0 : i32
    %c0_i32_0 = arith.constant 0 : i32
    return %arg0, %c0_i32 : i32, i32
  }
  func.func @transform_1(%arg0: i32) -> (i32, i32) {
    %c0_i32 = arith.constant 0 : i32
    %c0_i32_0 = arith.constant 0 : i32
    %c0_i32_1 = arith.constant 0 : i32
    return %c0_i32, %c0_i32_0 : i32, i32
  }
  func.func @transform_2(%arg0: i32) -> (i32, i32) {
    %c0_i32 = arith.constant 0 : i32
    %c0_i32_0 = arith.constant 0 : i32
    %c0_i32_1 = arith.constant 0 : i32
    return %c0_i32, %c0_i32_0 : i32, i32
  }
  func.func @transform_3(%arg0: i32) -> (i32, i32) {
    %c0_i32 = arith.constant 0 : i32
    %c0_i32_0 = arith.constant 0 : i32
    %c0_i32_1 = arith.constant 0 : i32
    return %c0_i32, %c0_i32_0 : i32, i32
  }
  func.func @transform_4(%arg0: i32) -> (i32, i32) {
    %c0_i32 = arith.constant 0 : i32
    %c0_i32_0 = arith.constant 0 : i32
    %c0_i32_1 = arith.constant 0 : i32
    return %c0_i32, %c0_i32_0 : i32, i32
  }
  func.func @transform_5(%arg0: i32) -> (i32, i32) {
    %c0_i32 = arith.constant 0 : i32
    %c0_i32_0 = arith.constant 0 : i32
    return %arg0, %c0_i32 : i32, i32
  }
}

</mosaic_0001>

<bundles_post_ra>
// kernel: mlp_forward.1
= control target key start
LH: loop header
LB: loop body
LE: loop exit
PB: predicated region body
PF: predicated region fallthrough
CT: control target
= control target key end

     0   :  { %10 = vsyncpa [#allocation3], 0  ;;  %s545_s0 = inlined_call_operand.vmem [shape: bf16[8,128], index: 0, kind: input, shape index: {}]   ;;  %s546_s1 = inlined_call_operand.hbm [shape: bf16[128,128], index: 1, kind: input, shape index: {}]   ;;  %s547_s2 = inlined_call_operand.vmem [shape: f32[1,128], index: 2, kind: input, shape index: {}]   ;;  %s548_s3 = inlined_call_operand.hbm [shape: bf16[128,128], index: 3, kind: input, shape index: {}]   ;;  %s549_s4 = inlined_call_operand.vmem [shape: f32[1,128], index: 4, kind: input, shape index: {}]   ;;  %s550_s5 = inlined_call_operand.hbm [shape: f32[8,128], index: 5, kind: output, shape index: {}]  }
   0x1   :  { %11 = vsyncpa [#allocation6], 0 }
   0x2   :  { %12 = vsyncpa [#allocation4], 0  ;;  %s463_s18 = smov [#allocation2]   ;;  %s391_s22 = scalar_lea.hbm %s546_s1, 1024 }
   0x3   :  { %s20_s19 = sshll.u32 %s463_s18, 4  ;;  %p392_p0 = scmp.ne.s32.totalorder %s546_s1, %s391_s22  ;;  %s21_s19 = int_to_ptr.vmem [resolvable:$true] %s20_s19 }
   0x4   :  { %p395_p1 = scmp.lt.u32.totalorder %s391_s22, %s546_s1 }
   0x6   :  { %p397_p2 = pnand %p395_p1, %p392_p0 }
   0x8   :  { %400 = shalt.err (!%p397_p2)
}
   0x9   :  { %s401_s27 = scalar_lea.vmem %s21_s19, 1024  ;;  %p406_p4 = scmp.lt.s32.totalorder %s21_s19, %s21_s19 }
   0xa   :  { %p402_p3 = scmp.ne.s32.totalorder %s21_s19, %s401_s27  ;;  %p407_p5 = scmp.lt.s32.totalorder %s401_s27, %s401_s27 }
   0xc   :  { %p408_p6 = por %p407_p5, %p406_p4 }
   0xe   :  { %p409_p7 = pnand %p408_p6, %p402_p3 }
  0x10   :  { %412 = shalt.err (!%p409_p7)
}
  0x11   :  { %s464_s28 = smov 64   ;;  %s465_s29 = smov 4  }
  0x12   :  { %26 = dma.hbm_to_vmem [thread:$0]  %s546_s1, 1024, %s21_s19, [#allocation3], %s464_s28, %s464_s28, %s465_s29  }
  0x13   :  { %s466_s7 = smov [#allocation5]   ;;  %s413_s11 = scalar_lea.hbm %s548_s3, 1024 }
  0x14   :  { %s34_s8 = sshll.u32 %s466_s7, 4  ;;  %p414_p8 = scmp.ne.s32.totalorder %s548_s3, %s413_s11  ;;  %s35_s8 = int_to_ptr.vmem [resolvable:$true] %s34_s8 }
  0x15   :  { %p417_p9 = scmp.lt.u32.totalorder %s413_s11, %s548_s3 }
  0x17   :  { %p419_p10 = pnand %p417_p9, %p414_p8 }
  0x19   :  { %422 = shalt.err (!%p419_p10)
}
  0x1a   :  { %s423_s16 = scalar_lea.vmem %s35_s8, 1024  ;;  %p428_p12 = scmp.lt.s32.totalorder %s35_s8, %s35_s8 }
  0x1b   :  { %p424_p11 = scmp.ne.s32.totalorder %s35_s8, %s423_s16  ;;  %p429_p13 = scmp.lt.s32.totalorder %s423_s16, %s423_s16 }
  0x1d   :  { %p430_p0 = por %p429_p13, %p428_p12 }
  0x1f   :  { %p431_p1 = pnand %p430_p0, %p424_p11 }
  0x21   :  { %434 = shalt.err (!%p431_p1)
}
  0x22   :  { %40 = dma.hbm_to_vmem [thread:$0]  %s548_s3, 1024, %s35_s8, [#allocation6], %s464_s28, %s464_s28, %s465_s29  }
  0x23   :  { %457 = dma.done.wait [#allocation3], 1024  }
  0x24   :  { %458 = vsyncadd [#allocation3], 4294966272 }
  0x25   :  { %459 = dma.done.wait [#allocation6], 1024  }
  0x26   :  { %460 = vsyncadd [#allocation6], 4294966272  ;;  %v467_v0 = vmov 0.0   ;;  %vm468_vm0 = vmmov 0   ;;  %v375_v1 = vld [vmem:[#allocation2] sm:$0xff]   ;;  %v376_v2 = vld [vmem:[#allocation2 + $0x8] sm:$0xff]  }
  0x27   :  { %328 = vmatprep.subr.bf16.mxu0 %v467_v0  ;;  %344 = vmatprep.mubr.msk.bf16.mxu0 %vm468_vm0, %v467_v0  ;;  %v377_v3 = vld [vmem:[#allocation2 + $0x10] sm:$0xff]   ;;  %v383_v4 = vld [vmem:[#allocation5] sm:$0xff]   ;;  %v378_v5 = vld [vmem:[#allocation2 + $0x18] sm:$0xff]   ;;  %s469_s22 = smov [#allocation7]  }
  0x28   :  { %348 = vmatprep.subr.bf16.mxu1 %v467_v0  ;;  %364 = vmatprep.mubr.msk.bf16.mxu1 %vm468_vm0, %v467_v0  ;;  %v384_v6 = vld [vmem:[#allocation5 + $0x8] sm:$0xff]   ;;  %v379_v7 = vld [vmem:[#allocation2 + $0x20] sm:$0xff]   ;;  %v385_v8 = vld [vmem:[#allocation5 + $0x10] sm:$0xff]   ;;  %s282_s23 = sshll.u32 %s469_s22, 4  ;;  %s283_s23 = int_to_ptr.vmem [resolvable:$true] %s282_s23 }
  0x29   :  { %329 = vmatpush3.bf16.msra.mxu0 %v375_v1  ;;  %349 = vmatpush3.bf16.msra.mxu1 %v383_v4  ;;  %v380_v9 = vld [vmem:[#allocation2 + $0x28] sm:$0xff]   ;;  %v386_v10 = vld [vmem:[#allocation5 + $0x18] sm:$0xff]   ;;  %v381_v11 = vld [vmem:[#allocation2 + $0x30] sm:$0xff]   ;;  %p440_p3 = scmp.lt.s32.totalorder %s283_s23, %s283_s23 }
  0x2a   :  { %330 = vmatprep.subr.bf16.mxu0 %v467_v0  ;;  %350 = vmatprep.subr.bf16.mxu1 %v467_v0  ;;  %v387_v12 = vld [vmem:[#allocation5 + $0x20] sm:$0xff]   ;;  %v382_v13 = vld [vmem:[#allocation2 + $0x38] sm:$0xff]   ;;  %v388_v14 = vld [vmem:[#allocation5 + $0x28] sm:$0xff]  }
  0x2b   :  { %v50_v15 = vld [vmem:[%s545_s0] sm:$0xf]  ;;  %v390_v17 = vld [vmem:[#allocation5 + $0x38] sm:$0xff]  }
  0x2c   :  { %v389_v16 = vld [vmem:[#allocation5 + $0x30] sm:$0xff]  }
  0x2d   :  { %331 = vmatpush3.bf16.msra.mxu0 %v376_v2  ;;  %351 = vmatpush3.bf16.msra.mxu1 %v384_v6  ;;  %v292_v18 = vld [vmem:[%s547_s2] ss:$0 sm:$0xff]  ;;  %s435_s2 = scalar_lea.vmem %s283_s23, 128 }
  0x2e   :  { %332 = vmatprep.subr.bf16.mxu0 %v467_v0  ;;  %352 = vmatprep.subr.bf16.mxu1 %v467_v0  ;;  %v301_v26 = vld [vmem:[%s549_s4] ss:$0 sm:$0xff]  ;;  %p436_p2 = scmp.ne.s32.totalorder %s283_s23, %s435_s2  ;;  %p441_p4 = scmp.lt.s32.totalorder %s435_s2, %s435_s2 }
  0x30   :  { %p442_p5 = por %p441_p4, %p440_p3 }
  0x31   :  { %333 = vmatpush3.bf16.msra.mxu0 %v377_v3  ;;  %353 = vmatpush3.bf16.msra.mxu1 %v385_v8 }
  0x32   :  { %334 = vmatprep.subr.bf16.mxu0 %v467_v0  ;;  %354 = vmatprep.subr.bf16.mxu1 %v467_v0  ;;  %p443_p6 = pnand %p442_p5, %p436_p2 }
  0x35   :  { %335 = vmatpush3.bf16.msra.mxu0 %v378_v5  ;;  %355 = vmatpush3.bf16.msra.mxu1 %v386_v10 }
  0x36   :  { %336 = vmatprep.subr.bf16.mxu0 %v467_v0  ;;  %356 = vmatprep.subr.bf16.mxu1 %v467_v0 }
  0x39   :  { %337 = vmatpush3.bf16.msra.mxu0 %v379_v7  ;;  %357 = vmatpush3.bf16.msra.mxu1 %v387_v12 }
  0x3a   :  { %338 = vmatprep.subr.bf16.mxu0 %v467_v0  ;;  %358 = vmatprep.subr.bf16.mxu1 %v467_v0 }
  0x3d   :  { %339 = vmatpush3.bf16.msra.mxu0 %v380_v9  ;;  %359 = vmatpush3.bf16.msra.mxu1 %v388_v14 }
  0x3e   :  { %340 = vmatprep.subr.bf16.mxu0 %v467_v0  ;;  %360 = vmatprep.subr.bf16.mxu1 %v467_v0 }
  0x41   :  { %341 = vmatpush3.bf16.msra.mxu0 %v381_v11  ;;  %361 = vmatpush3.bf16.msra.mxu1 %v389_v16 }
  0x42   :  { %342 = vmatprep.subr.bf16.mxu0 %v467_v0  ;;  %362 = vmatprep.subr.bf16.mxu1 %v467_v0 }
  0x45   :  { %343 = vmatpush3.bf16.msra.mxu0 %v382_v13  ;;  %363 = vmatpush3.bf16.msra.mxu1 %v390_v17 }
  0x48   :  { %345 = vmatmul.mubr.bf16.vlgmr.msra.gmra.mrb[0].mxu0 %v50_v15 }
 0x11b   :  { %v156_v19 = vpop.f32.mrb[0].mxu0 }
 0x11c   :  { %v157_v20 = vadd.f32 %v292_v18, %v156_v19  ;;  %v346_v21 = vpop.f32.mrb[1].mxu0 }
 0x11d   :  { %v159_v22 = vpop.f32.mrb[2].mxu0 }
 0x11e   :  { %v162_v23 = vmax.f32 %v157_v20, 0.0  ;;  %v347_v24 = vpop.f32.mrb[3].mxu0 }
 0x120   :  { %v163_v25 = vpack.c.bf16 %v162_v23, %v162_v23 }
 0x122   :  { %365 = vmatmul.mubr.bf16.vlgmr.msra.gmra.mrb[0].mxu1 %v163_v25 }
 0x1f5   :  { %v269_v27 = vpop.f32.mrb[0].mxu1 }
 0x1f6   :  { %v270_v28 = vadd.f32 %v301_v26, %v269_v27  ;;  %v366_v29 = vpop.f32.mrb[1].mxu1 }
 0x1f7   :  { %v272_v30 = vpop.f32.mrb[2].mxu1 }
 0x1f8   :  { %275 = vst [vmem:[#allocation7] sm:$0xff] %v270_v28  ;;  %v367_v31 = vpop.f32.mrb[3].mxu1 }
 0x1f9   :  { %446 = shalt.err (!%p443_p6)
}
 0x1fa   :  { %s447_s4 = scalar_lea.hbm %s550_s5, 128 }
 0x1fb   :  { %p448_p7 = scmp.ne.s32.totalorder %s550_s5, %s447_s4  ;;  %p451_p8 = scmp.lt.u32.totalorder %s447_s4, %s550_s5 }
 0x1fd   :  { %p453_p9 = pnand %p451_p8, %p448_p7 }
 0x1ff   :  { %456 = shalt.err (!%p453_p9)
}
 0x200   :  { %285 = dma.vmem_to_hbm [thread:$0]  %s283_s23, 128, %s550_s5, [#allocation4]  }
 0x201   :  { %461 = dma.done.wait [#allocation4], 128  }
 0x202   :  { %462 = vsyncadd [#allocation4], 4294967168 }
 0x203   :  { %289 = vsyncpa [#allocation3], 1 }
 0x204   :  { %290 = vsyncpa [#allocation6], 1 }
 0x205   :  { %291 = vsyncpa [#allocation4], 1 }

</bundles_post_ra>
